<compile_context>
chip_gen: v7x
topology: tpu7x:2x2x1
jax: 0.10.0
libtpu: 0.0.40
codegen_flags: <defaults>
</compile_context>

<pallas_src>
import functools

import jax
import jax.numpy as jnp
from jax.experimental import pallas as pl
from jax.experimental.pallas import tpu as pltpu


# --------------------------------------------------------------------------- #
# Generation-aware sizing (v5e/v6e: 128 MiB VMEM, v7x: 64 MiB per TensorCore)
# --------------------------------------------------------------------------- #

def _vmem_capacity_bytes():
    try:
        return int(pltpu.get_tpu_info().vmem_capacity_bytes)
    except Exception:
        return 64 << 20                      # conservative default (v7x-sized)


_VMEM_CAP = _vmem_capacity_bytes()
_VMEM_LIMIT_BYTES = int(min(_VMEM_CAP * 3 // 4, 96 << 20))   # scoped-VMEM request
_TARGET_TILE_BYTES = int(max(2 << 20, _VMEM_CAP // 16))      # 8 MiB (128M parts) / 4 MiB (v7x)
_FUSED_X_LIMIT = int(_VMEM_CAP // 16)        # fused path if f32 x is at most this

_VMEM_WHOLE = pl.BlockSpec(memory_space=pltpu.MemorySpace.VMEM)


def _round_up(x, m):
    return ((x + m - 1) // m) * m


def _sublane_pack(dtype):
    return max(8, 32 // jnp.dtype(dtype).itemsize)


def _pick_row_tile(rows, lanes, dtype):
    """Largest sublane-pack-multiple row tile with tile bytes <= target."""
    itemsize = jnp.dtype(dtype).itemsize
    pack = _sublane_pack(dtype)
    tr = (_TARGET_TILE_BYTES // max(1, lanes * itemsize)) // pack * pack
    tr = max(pack, tr)
    tr = min(tr, _round_up(rows, pack))
    return int(tr)


def _pick_lane_blocks(lanes):
    """Split the stats sweep over lane blocks (both v7x TCs) when cleanly possible."""
    if lanes >= 512 and lanes % 256 == 0:
        return 2
    return 1


# --------------------------------------------------------------------------- #
# Fused single-call kernels (whole x resident in VMEM)
# --------------------------------------------------------------------------- #

def _fused_kernel_3d(x_ref, g_ref, b_ref, y_ref, mean_ref, var_ref):
    """4-D semantics on an (R=N*C, H, W) view: per-W stats over (R, H)."""
    x = x_ref[...].astype(jnp.float32)                 # (R, H, W)
    r, h, _ = x.shape
    count = jnp.float32(r * h)
    s = jnp.sum(x, axis=0, keepdims=True)              # (1, H, W)
    s = jnp.sum(s, axis=1, keepdims=True)              # (1, 1, W)
    mean = s / count
    diff = x - mean
    v = jnp.sum(diff * diff, axis=0, keepdims=True)
    v = jnp.sum(v, axis=1, keepdims=True) / count      # (1, 1, W)  (two-pass, matches ref)
    invstd = jax.lax.rsqrt(v)                          # no eps: matches ref training path
    g = g_ref[...].astype(jnp.float32)                 # (R, 1, 1)
    b = b_ref[...].astype(jnp.float32)
    y_ref[...] = (g * (diff * invstd) + b).astype(y_ref.dtype)
    mean_ref[...] = mean
    var_ref[...] = v


def _fused_kernel_2d(x_ref, g_ref, b_ref, y_ref, mean_ref, var_ref):
    """2-D semantics: per-feature stats over rows."""
    x = x_ref[...].astype(jnp.float32)                 # (N, F)
    count = jnp.float32(x.shape[0])
    mean = jnp.sum(x, axis=0, keepdims=True) / count   # (1, F)
    diff = x - mean
    var = jnp.sum(diff * diff, axis=0, keepdims=True) / count
    invstd = jax.lax.rsqrt(var)                        # no eps: matches ref training path
    y_ref[...] = (g_ref[...].astype(jnp.float32) * (diff * invstd)
                  + b_ref[...].astype(jnp.float32)).astype(y_ref.dtype)
    mean_ref[...] = mean
    var_ref[...] = var


def _fused_call(kernel, x, g, b, stat_shape):
    return pl.pallas_call(
        kernel,
        out_shape=(jax.ShapeDtypeStruct(x.shape, x.dtype),
                   jax.ShapeDtypeStruct(stat_shape, jnp.float32),
                   jax.ShapeDtypeStruct(stat_shape, jnp.float32)),
        in_specs=[_VMEM_WHOLE, _VMEM_WHOLE, _VMEM_WHOLE],
        out_specs=(_VMEM_WHOLE, _VMEM_WHOLE, _VMEM_WHOLE),
        compiler_params=pltpu.CompilerParams(vmem_limit_bytes=_VMEM_LIMIT_BYTES),
    )(x, g, b)


# --------------------------------------------------------------------------- #
# Tiled two-pass kernels (large activations)
# --------------------------------------------------------------------------- #

def _stats_kernel(x_ref, sum_ref, sumsq_ref, *, total_rows):
    """Accumulate per-lane sum / sum-of-squares over the row grid axis.

    Grid = (lane_blocks [parallel], row_tiles [arbitrary]); the (1, tl) output
    blocks have a row-invariant index_map, so they stay resident in VMEM across
    the row sweep.  `total_rows` (static) masks garbage rows of a partial last
    block; Pallas does NOT zero out-of-bounds input data.
    """
    i = pl.program_id(1)

    @pl.when(i == 0)
    def _():
        sum_ref[...] = jnp.zeros_like(sum_ref)
        sumsq_ref[...] = jnp.zeros_like(sumsq_ref)

    x = x_ref[...].astype(jnp.float32)
    if total_rows is not None:
        row = i * x_ref.shape[0] + jax.lax.broadcasted_iota(jnp.int32, x_ref.shape, 0)
        x = jnp.where(row < total_rows, x, 0.0)
    sum_ref[...] += jnp.sum(x, axis=0, keepdims=True)
    sumsq_ref[...] += jnp.sum(x * x, axis=0, keepdims=True)


def _normalize_kernel(x_ref, g_ref, b_ref, mean_ref, invstd_ref, y_ref):
    """y = gamma * (x - mean) * invstd + beta for one row tile.

    gamma/beta arrive either as a (TR, 1) per-row column (4-D case) or a (1, L)
    per-lane row (2-D case); jnp broadcasting handles both.  Partial last
    blocks compute on garbage rows but Pallas drops the out-of-bounds writes.
    """
    x = x_ref[...].astype(jnp.float32)
    z = (x - mean_ref[...]) * invstd_ref[...]
    y_ref[...] = (g_ref[...].astype(jnp.float32) * z
                  + b_ref[...].astype(jnp.float32)).astype(y_ref.dtype)


def _column_sums(x2, tr):
    """Per-lane (sum, sum_sq) over all rows of x2, no padding copies."""
    rows, lanes = x2.shape
    nl = _pick_lane_blocks(lanes)
    tl = lanes // nl
    n_row = pl.cdiv(rows, tr)
    ragged = (rows % tr) != 0
    kernel = functools.partial(_stats_kernel, total_rows=rows if ragged else None)
    return pl.pallas_call(
        kernel,
        out_shape=(jax.ShapeDtypeStruct((1, lanes), jnp.float32),
                   jax.ShapeDtypeStruct((1, lanes), jnp.float32)),
        grid_spec=pltpu.PrefetchScalarGridSpec(
            num_scalar_prefetch=0,
            grid=(nl, n_row),
            in_specs=[pl.BlockSpec((tr, tl), lambda j, i: (i, j))],
            out_specs=(pl.BlockSpec((1, tl), lambda j, i: (0, j)),
                       pl.BlockSpec((1, tl), lambda j, i: (0, j))),
        ),
        compiler_params=pltpu.CompilerParams(
            dimension_semantics=("parallel", "arbitrary"),
            vmem_limit_bytes=_VMEM_LIMIT_BYTES),
    )(x2)


def _normalize(x2, g, b, mean_row, invstd_row, tr, g_per_row):
    rows, lanes = x2.shape
    n_row = pl.cdiv(rows, tr)
    if g_per_row:
        p_spec = pl.BlockSpec((tr, 1), lambda i: (i, 0))       # per-row column
    else:
        p_spec = pl.BlockSpec((1, lanes), lambda i: (0, 0))    # per-lane row
    stat_spec = pl.BlockSpec((1, lanes), lambda i: (0, 0))
    return pl.pallas_call(
        _normalize_kernel,
        out_shape=jax.ShapeDtypeStruct((rows, lanes), x2.dtype),
        grid_spec=pltpu.PrefetchScalarGridSpec(
            num_scalar_prefetch=0,
            grid=(n_row,),
            in_specs=[pl.BlockSpec((tr, lanes), lambda i: (i, 0)),
                      p_spec, p_spec, stat_spec, stat_spec],
            out_specs=pl.BlockSpec((tr, lanes), lambda i: (i, 0)),
        ),
        compiler_params=pltpu.CompilerParams(
            dimension_semantics=("parallel",),
            vmem_limit_bytes=_VMEM_LIMIT_BYTES),
    )(x2, g, b, mean_row, invstd_row)


# --------------------------------------------------------------------------- #
# Forward implementations (fused / tiled) and dispatch
# --------------------------------------------------------------------------- #

def _per_row_params(gamma, beta, N, C):
    """Thin per-row (per-channel) param columns, shape (N*C, 1), f32."""
    g = jnp.broadcast_to(gamma.reshape(1, C).astype(jnp.float32), (N, C)).reshape(N * C, 1)
    b = jnp.broadcast_to(beta.reshape(1, C).astype(jnp.float32), (N, C)).reshape(N * C, 1)
    return g, b


def _batch_norm_4d_fused(x, gamma, beta):
    N, C, H, W = x.shape
    R = N * C
    g_col, b_col = _per_row_params(gamma, beta, N, C)
    y3, mean, var = _fused_call(_fused_kernel_3d,
                                x.reshape(R, H, W),
                                g_col.reshape(R, 1, 1),
                                b_col.reshape(R, 1, 1),
                                (1, 1, W))
    return y3.reshape(N, C, H, W), mean.reshape(1, 1, 1, W), var.reshape(1, 1, 1, W)


def _batch_norm_4d_tiled(x, gamma, beta):
    N, C, H, W = x.shape
    R, L = N * C, H * W
    x2 = x.reshape(R, L)                                    # lane-dense: lanes = H*W
    g_col, b_col = _per_row_params(gamma, beta, N, C)

    tr = _pick_row_tile(R, L, x2.dtype)
    s1, s2 = _column_sums(x2, tr)                           # each (1, H*W) f32
    # Tiny finalize (O(H*W) elements) in plain JAX: fold H sub-lanes -> per-W stats.
    count = jnp.float32(N * C * H)
    mean = s1.reshape(H, W).sum(axis=0) / count             # (W,)
    # One-pass variance (E[x^2]-E[x]^2) with clamp; fused path uses exact two-pass.
    var = jnp.maximum(s2.reshape(H, W).sum(axis=0) / count - mean * mean, 0.0)
    invstd = jax.lax.rsqrt(var)                             # no eps: matches ref training path

    mean_row = jnp.tile(mean, H).reshape(1, L)              # lane l = h*W + w -> mean[w]
    invstd_row = jnp.tile(invstd, H).reshape(1, L)

    y2 = _normalize(x2, g_col, b_col, mean_row, invstd_row, tr, g_per_row=True)
    return y2.reshape(N, C, H, W), mean.reshape(1, 1, 1, W), var.reshape(1, 1, 1, W)


def _batch_norm_2d_fused(x, gamma, beta):
    N, F = x.shape
    g_row = gamma.reshape(1, F).astype(jnp.float32)
    b_row = beta.reshape(1, F).astype(jnp.float32)
    y, mean, var = _fused_call(_fused_kernel_2d, x, g_row, b_row, (1, F))
    return y, mean.reshape(F), var.reshape(F)


def _batch_norm_2d_tiled(x, gamma, beta):
    N, F = x.shape
    g_row = gamma.reshape(1, F).astype(jnp.float32)
    b_row = beta.reshape(1, F).astype(jnp.float32)

    tr = _pick_row_tile(N, F, x.dtype)
    s1, s2 = _column_sums(x, tr)
    count = jnp.float32(N)
    mean = s1.reshape(F) / count
    var = jnp.maximum(s2.reshape(F) / count - mean * mean, 0.0)
    invstd = jax.lax.rsqrt(var)                             # no eps: matches ref training path

    y = _normalize(x, g_row, b_row, mean.reshape(1, F), invstd.reshape(1, F),
                   tr, g_per_row=False)
    return y, mean, var


@jax.jit
def batch_norm_4d(x, gamma, beta):
    """x: (N, C, H, W); gamma/beta: (1, C, 1, 1). Stats over dims (0,1,2), keepdim."""
    N, C, H, W = x.shape
    if N * C * H * W * 4 <= _FUSED_X_LIMIT:
        return _batch_norm_4d_fused(x, gamma, beta)
    return _batch_norm_4d_tiled(x, gamma, beta)


@jax.jit
def batch_norm_2d(x, gamma, beta):
    """x: (N, F); gamma/beta: (1, F). Stats over dim 0 (per-feature)."""
    N, F = x.shape
    if N * F * 4 <= _FUSED_X_LIMIT:
        return _batch_norm_2d_fused(x, gamma, beta)
    return _batch_norm_2d_tiled(x, gamma, beta)


class BatchNorm:
    """JAX/Pallas mirror of the PyTorch BatchNorm module (training forward)."""

    def __init__(self, num_feature, num_dims):
        if num_dims == 2:
            shape = (1, num_feature)
        else:
            shape = (1, num_feature, 1, 1)
        self.gamma = jnp.ones(shape, jnp.float32)
        self.beta = jnp.zeros(shape, jnp.float32)
        self.moving_mean = jnp.zeros(shape, jnp.float32)
        self.moving_var = jnp.ones(shape, jnp.float32)
        self.num_dims = num_dims
        self.momentum = 0.9

    def __call__(self, x):
        if self.num_dims == 4:
            y, mean, var = batch_norm_4d(x, self.gamma, self.beta)
        else:
            y, mean, var = batch_norm_2d(x, self.gamma, self.beta)
        # Reproduce the reference's moving-stat update, including its broadcast
        # quirk (4-D: (1,C,1,1) vs (1,1,1,W) grows the state to (1,C,1,W)).
        self.moving_mean = self.momentum * self.moving_mean + (1.0 - self.momentum) * mean
        self.moving_var = self.momentum * self.moving_var + (1.0 - self.momentum) * var
        return y


# --------------------------------------------------------------------------- #
# Pure-JAX references and smoke test
# --------------------------------------------------------------------------- #

def _ref_bn4d(x, gamma, beta):
    mean = x.mean(axis=(0, 1, 2), keepdims=True)
    var = ((x - mean) ** 2).mean(axis=(0, 1, 2), keepdims=True)
    return gamma * ((x - mean) / jnp.sqrt(var)) + beta


def _ref_bn2d(x, gamma, beta):
    mean = x.mean(axis=0)
    var = ((x - mean) ** 2).mean(axis=0)
    return gamma * ((x - mean) / jnp.sqrt(var)) + beta


if __name__ == "__main__":
    key = jax.random.PRNGKey(0)
    k1, k2, k3, k4 = jax.random.split(key, 4)

    # Module-style usage at the small shapes the reference net implies (fused path).
    x4 = jax.random.normal(k1, (2, 4, 16, 16), dtype=jnp.float32)
    bn4 = BatchNorm(4, num_dims=4)
    y4 = bn4(x4)

    x2 = jax.random.normal(k2, (8, 32), dtype=jnp.float32)
    bn2 = BatchNorm(32, num_dims=2)
    y2 = bn2(x2)

    # Explicitly exercise the tiled multi-pass path (ragged rows, partial blocks,
    # lane-split stats axis) regardless of which generation we run on.
    xt2 = jax.random.normal(k3, (1001, 384), dtype=jnp.float32)
    gt2 = jnp.full((1, 384), 1.5, jnp.float32)
    bt2 = jnp.full((1, 384), -0.25, jnp.float32)
    yt2, _, _ = jax.jit(_batch_norm_2d_tiled)(xt2, gt2, bt2)

    xt4 = jax.random.normal(k4, (65, 40, 8, 128), dtype=jnp.float32)
    gt4 = jnp.linspace(0.5, 1.5, 40, dtype=jnp.float32).reshape(1, 40, 1, 1)
    bt4 = jnp.linspace(-0.5, 0.5, 40, dtype=jnp.float32).reshape(1, 40, 1, 1)
    yt4, _, _ = jax.jit(_batch_norm_4d_tiled)(xt4, gt4, bt4)

    jax.block_until_ready((y4, y2, yt2, yt4))

    ref4 = _ref_bn4d(x4, bn4.gamma, bn4.beta)
    ref2 = _ref_bn2d(x2, bn2.gamma, bn2.beta)
    reft2 = _ref_bn2d(xt2, gt2, bt2)
    reft4 = _ref_bn4d(xt4, gt4, bt4)

    assert y4.shape == x4.shape and y4.dtype == x4.dtype
    assert y2.shape == x2.shape and y2.dtype == x2.dtype
    assert jnp.allclose(y4, ref4, atol=1e-4, rtol=1e-4)
    assert jnp.allclose(y2, ref2, atol=1e-4, rtol=1e-4)
    assert jnp.allclose(yt2, reft2, atol=2e-3, rtol=2e-3)
    assert jnp.allclose(yt4, reft4, atol=2e-3, rtol=2e-3)

    print("KERNEL_OK")
</pallas_src>

<mosaic_0001>
module attributes {stable_mosaic.version = 11 : i64} {
  func.func @_fused_kernel_3d(%arg0: memref<8x16x16xf32, #tpu.memory_space<vmem>>, %arg1: memref<8x1x1xf32, #tpu.memory_space<vmem>>, %arg2: memref<8x1x1xf32, #tpu.memory_space<vmem>>, %arg3: memref<8x16x16xf32, #tpu.memory_space<vmem>>, %arg4: memref<1x1x16xf32, #tpu.memory_space<vmem>>, %arg5: memref<1x1x16xf32, #tpu.memory_space<vmem>>) attributes {dimension_semantics = [], scalar_prefetch = 0 : i64, scratch_operands = 0 : i64, tpu.core_type = #tpu.core_type<tc>} {
    %c0 = arith.constant 0 : index
    %c0_0 = arith.constant 0 : index
    %c0_1 = arith.constant 0 : index
    %0 = vector.load %arg0[%c0, %c0_0, %c0_1] : memref<8x16x16xf32, #tpu.memory_space<vmem>>, vector<8x16x16xf32>
    %cst = arith.constant dense<0.000000e+00> : vector<16x16xf32>
    %1 = vector.multi_reduction <add>, %0, %cst [0] : vector<8x16x16xf32> to vector<16x16xf32>
    %2 = vector.shape_cast %1 : vector<16x16xf32> to vector<1x16x16xf32>
    %cst_2 = arith.constant dense<0.000000e+00> : vector<1x16xf32>
    %3 = vector.multi_reduction <add>, %2, %cst_2 [1] : vector<1x16x16xf32> to vector<1x16xf32>
    %4 = vector.shape_cast %3 : vector<1x16xf32> to vector<1x1x16xf32>
    %cst_3 = arith.constant 1.280000e+02 : f32
    %5 = vector.broadcast %cst_3 : f32 to vector<1x1x16xf32>
    %6 = arith.divf %4, %5 : vector<1x1x16xf32>
    %7 = vector.broadcast %6 : vector<1x1x16xf32> to vector<8x16x16xf32>
    %8 = arith.subf %0, %7 : vector<8x16x16xf32>
    %9 = arith.mulf %8, %8 : vector<8x16x16xf32>
    %cst_4 = arith.constant dense<0.000000e+00> : vector<16x16xf32>
    %10 = vector.multi_reduction <add>, %9, %cst_4 [0] : vector<8x16x16xf32> to vector<16x16xf32>
    %11 = vector.shape_cast %10 : vector<16x16xf32> to vector<1x16x16xf32>
    %cst_5 = arith.constant dense<0.000000e+00> : vector<1x16xf32>
    %12 = vector.multi_reduction <add>, %11, %cst_5 [1] : vector<1x16x16xf32> to vector<1x16xf32>
    %13 = vector.shape_cast %12 : vector<1x16xf32> to vector<1x1x16xf32>
    %cst_6 = arith.constant 1.280000e+02 : f32
    %14 = vector.broadcast %cst_6 : f32 to vector<1x1x16xf32>
    %15 = arith.divf %13, %14 : vector<1x1x16xf32>
    %16 = math.rsqrt %15 : vector<1x1x16xf32>
    %c0_7 = arith.constant 0 : index
    %c0_8 = arith.constant 0 : index
    %c0_9 = arith.constant 0 : index
    %17 = vector.load %arg1[%c0_7, %c0_8, %c0_9] : memref<8x1x1xf32, #tpu.memory_space<vmem>>, vector<8x1x1xf32>
    %c0_10 = arith.constant 0 : index
    %c0_11 = arith.constant 0 : index
    %c0_12 = arith.constant 0 : index
    %18 = vector.load %arg2[%c0_10, %c0_11, %c0_12] : memref<8x1x1xf32, #tpu.memory_space<vmem>>, vector<8x1x1xf32>
    %19 = vector.broadcast %16 : vector<1x1x16xf32> to vector<8x16x16xf32>
    %20 = arith.mulf %8, %19 : vector<8x16x16xf32>
    %21 = vector.broadcast %17 : vector<8x1x1xf32> to vector<8x16x16xf32>
    %22 = arith.mulf %21, %20 : vector<8x16x16xf32>
    %23 = vector.broadcast %18 : vector<8x1x1xf32> to vector<8x16x16xf32>
    %24 = arith.addf %22, %23 : vector<8x16x16xf32>
    %c0_13 = arith.constant 0 : index
    %c0_14 = arith.constant 0 : index
    %c0_15 = arith.constant 0 : index
    %25 = vector.load %arg3[%c0_13, %c0_14, %c0_15] : memref<8x16x16xf32, #tpu.memory_space<vmem>>, vector<8x16x16xf32>
    tpu.vector_store %arg3[%c0_13, %c0_14, %c0_15], %24 {strides = array<i32>} : memref<8x16x16xf32, #tpu.memory_space<vmem>>, vector<8x16x16xf32>,
    %c0_16 = arith.constant 0 : index
    %c0_17 = arith.constant 0 : index
    %c0_18 = arith.constant 0 : index
    %26 = vector.load %arg4[%c0_16, %c0_17, %c0_18] : memref<1x1x16xf32, #tpu.memory_space<vmem>>, vector<1x1x16xf32>
    tpu.vector_store %arg4[%c0_16, %c0_17, %c0_18], %6 {strides = array<i32>} : memref<1x1x16xf32, #tpu.memory_space<vmem>>, vector<1x1x16xf32>,
    %c0_19 = arith.constant 0 : index
    %c0_20 = arith.constant 0 : index
    %c0_21 = arith.constant 0 : index
    %27 = vector.load %arg5[%c0_19, %c0_20, %c0_21] : memref<1x1x16xf32, #tpu.memory_space<vmem>>, vector<1x1x16xf32>
    tpu.vector_store %arg5[%c0_19, %c0_20, %c0_21], %15 {strides = array<i32>} : memref<1x1x16xf32, #tpu.memory_space<vmem>>, vector<1x1x16xf32>,
    return
  }
}

</mosaic_0001>

<bundles_post_ra>
// kernel: batch_norm_4d.1
= control target key start
LH: loop header
LB: loop body
LE: loop exit
PB: predicated region body
PF: predicated region fallthrough
CT: control target
= control target key end

     0   :  { %11 = vsyncpa [#allocation3], 0  ;;  %s893_s0 = inlined_call_operand.hbm [shape: f32[8,16,16], index: 0, kind: input, shape index: {}]   ;;  %s894_s1 = inlined_call_operand.vmem [shape: f32[8,1,1], index: 1, kind: input, shape index: {}]   ;;  %s895_s2 = inlined_call_operand.vmem [shape: f32[8,1,1], index: 2, kind: input, shape index: {}]   ;;  %s896_s3 = inlined_call_operand.hbm [shape: f32[8,16,16], index: 3, kind: output, shape index: {0}]   ;;  %s897_s4 = inlined_call_operand.hbm [shape: f32[1,1,16], index: 4, kind: output, shape index: {1}]   ;;  %s898_s5 = inlined_call_operand.hbm [shape: f32[1,1,16], index: 5, kind: output, shape index: {2}]  }
   0x1   :  { %12 = vsyncpa [#allocation4], 0 }
   0x2   :  { %13 = vsyncpa [#allocation7], 0  ;;  %s556_s18 = smov [#allocation2]   ;;  %s462_s22 = scalar_lea.hbm %s893_s0, 2048 }
   0x3   :  { %s19_s19 = sshll.u32 %s556_s18, 4  ;;  %p463_p0 = scmp.ne.s32.totalorder %s893_s0, %s462_s22  ;;  %s20_s19 = int_to_ptr.vmem [resolvable:$true] %s19_s19 }
   0x4   :  { %p466_p1 = scmp.lt.u32.totalorder %s462_s22, %s893_s0 }
   0x6   :  { %p468_p2 = pnand %p466_p1, %p463_p0 }
   0x8   :  { %471 = shalt.err (!%p468_p2)
}
   0x9   :  { %s472_s27 = scalar_lea.vmem %s20_s19, 2048  ;;  %p477_p4 = scmp.lt.s32.totalorder %s20_s19, %s20_s19 }
   0xa   :  { %p473_p3 = scmp.ne.s32.totalorder %s20_s19, %s472_s27  ;;  %p478_p5 = scmp.lt.s32.totalorder %s472_s27, %s472_s27 }
   0xc   :  { %p479_p6 = por %p478_p5, %p477_p4 }
   0xe   :  { %p480_p7 = pnand %p479_p6, %p473_p3 }
  0x10   :  { %483 = shalt.err (!%p480_p7)
}
  0x11   :  { %s557_s28 = smov 128   ;;  %s558_s29 = smov 8  }
  0x12   :  { %25 = dma.hbm_to_vmem [thread:$0]  %s893_s0, 2048, %s20_s19, [#allocation3], %s557_s28, %s557_s28, %s558_s29  }
  0x13   :  { %550 = dma.done.wait [#allocation3], 2048  }
  0x14   :  { %551 = vsyncadd [#allocation3], 4294965248  ;;  %v559_v0 = vmov 0   ;;  %v437_v1 = vld [vmem:[%s894_s1 + $0x2] ss:$0 sm:$0xff]  ;;  %vm49_vm0 = vcmask 130048  }
  0x15   :  { %459 = vset.pattern.permute.xlu1 %v559_v0  ;;  %458 = vset.pattern.permute.xlu0 %v559_v0  ;;  %v435_v2 = vld [vmem:[%s894_s1] ss:$0 sm:$0xff]  ;;  %v438_v3 = vld [vmem:[%s894_s1 + $0x3] ss:$0 sm:$0xff]  ;;  %v436_v4 = vld [vmem:[%s894_s1 + $0x1] ss:$0 sm:$0xff] }
  0x16   :  { %245 = vperm.xlu1 %459, %v437_v1   ;;  %237 = vperm.xlu0 %458, %v435_v2   ;;  %v440_v5 = vld [vmem:[%s894_s1 + $0x5] ss:$0 sm:$0xff]  ;;  %v439_v6 = vld [vmem:[%s894_s1 + $0x4] ss:$0 sm:$0xff]  ;;  %v628_v8 = vld [vmem:[#allocation2 + $0x8] sm:$0xff]  ;;  %s560_s13 = smov [#allocation6]  }
  0x17   :  { %v626_v7 = vld [vmem:[#allocation2] sm:$0xff]  ;;  %v630_v9 = vld [vmem:[#allocation2 + $0x10] sm:$0xff]  ;;  %v632_v10 = vld [vmem:[#allocation2 + $0x18] sm:$0xff]  ;;  %v65_v13 = vsel %vm49_vm0, %v628_v8, 0.0  ;;  %s409_s14 = sshll.u32 %s560_s13, 4  ;;  %vm388_vm1 = vcmask 122880   ;;  %s410_s14 = int_to_ptr.vmem [resolvable:$true] %s409_s14 }
  0x18   :  { %v634_v11 = vld [vmem:[#allocation2 + $0x20] sm:$0xff]  ;;  %v50_v12 = vsel %vm49_vm0, %v626_v7, 0.0  ;;  %v640_v14 = vld [vmem:[#allocation2 + $0x28] sm:$0xff]  ;;  %v642_v15 = vld [vmem:[#allocation2 + $0x30] sm:$0xff]  ;;  %v51_v17 = vsel %vm49_vm0, %v630_v9, 0.0  ;;  %v66_v19 = vsel %vm49_vm0, %v632_v10, 0.0  ;;  %p489_p9 = scmp.lt.s32.totalorder %s410_s14, %s410_s14 }
  0x19   :  { %v644_v16 = vld [vmem:[#allocation2 + $0x38] sm:$0xff]  ;;  %v53_v18 = vsel %vm49_vm0, %v634_v11, 0.0  ;;  %v652_v20 = vld [vmem:[#allocation2 + $0x40] sm:$0xff]  ;;  %v654_v21 = vld [vmem:[#allocation2 + $0x48] sm:$0xff]  ;;  %v52_v22 = vadd.f32 %v51_v17, %v50_v12  ;;  %v67_v23 = vadd.f32 %v66_v19, %v65_v13  ;;  %v68_v24 = vsel %vm49_vm0, %v640_v14, 0.0  ;;  %s488_s15 = scalar_lea.vmem %s410_s14, 32 }
  0x1a   :  { %249 = vperm.xlu1 %459, %v438_v3   ;;  %241 = vperm.xlu0 %458, %v436_v4   ;;  %v442_v25 = vld [vmem:[%s894_s1 + $0x7] ss:$0 sm:$0xff]  ;;  %v55_v26 = vsel %vm49_vm0, %v642_v15, 0.0  ;;  %v70_v27 = vsel %vm49_vm0, %v644_v16, 0.0  ;;  %v441_v28 = vld [vmem:[%s894_s1 + $0x6] ss:$0 sm:$0xff] }
  0x1b   :  { %v668_v29 = vld [vmem:[#allocation2 + $0x50] sm:$0xff]  ;;  %v670_v30 = vld [vmem:[#allocation2 + $0x58] sm:$0xff]  ;;  %v54_v31 = vadd.f32 %v53_v18, %v52_v22  ;;  %v69_v32 = vadd.f32 %v68_v24, %v67_v23  ;;  %v57_v33 = vsel %vm49_vm0, %v652_v20, 0.0  ;;  %v72_v34 = vsel %vm49_vm0, %v654_v21, 0.0  ;;  %v676_v35 = vld [vmem:[#allocation2 + $0x60] sm:$0xff] }
  0x1c   :  { %v678_v36 = vld [vmem:[#allocation2 + $0x68] sm:$0xff]  ;;  %v444_v39 = vld [vmem:[%s895_s2 + $0x1] ss:$0 sm:$0xff]  ;;  %v59_v40 = vsel %vm49_vm0, %v668_v29, 0.0  ;;  %v74_v41 = vsel %vm49_vm0, %v670_v30, 0.0  ;;  %v690_v43 = vld [vmem:[#allocation2 + $0x70] sm:$0xff] }
  0x1d   :  { %v56_v37 = vadd.f32 %v55_v26, %v54_v31  ;;  %v71_v38 = vadd.f32 %v70_v27, %v69_v32  ;;  %v443_v42 = vld [vmem:[%s895_s2] ss:$0 sm:$0xff]  ;;  %v692_v44 = vld [vmem:[#allocation2 + $0x78] sm:$0xff]  ;;  %v61_v47 = vsel %vm49_vm0, %v676_v35, 0.0  ;;  %v76_v48 = vsel %vm49_vm0, %v678_v36, 0.0 }
  0x1e   :  { %257 = vperm.xlu1 %459, %v440_v5   ;;  %253 = vperm.xlu0 %458, %v439_v6   ;;  %v63_v51 = vsel %vm49_vm0, %v690_v43, 0.0  ;;  %v78_v52 = vsel %vm49_vm0, %v692_v44, 0.0  ;;  %v446_v53 = vld [vmem:[%s895_s2 + $0x3] ss:$0 sm:$0xff]  ;;  %v445_v54 = vld [vmem:[%s895_s2 + $0x2] ss:$0 sm:$0xff] }
  0x1f   :  { %v58_v45 = vadd.f32 %v57_v33, %v56_v37  ;;  %v73_v46 = vadd.f32 %v72_v34, %v71_v38  ;;  %v448_v59 = vld [vmem:[%s895_s2 + $0x5] ss:$0 sm:$0xff]  ;;  %v447_v60 = vld [vmem:[%s895_s2 + $0x4] ss:$0 sm:$0xff]  ;;  %v450_v1 = vld [vmem:[%s895_s2 + $0x7] ss:$0 sm:$0xff] }
  0x20   :  { %v449_v2 = vld [vmem:[%s895_s2 + $0x6] ss:$0 sm:$0xff]  ;;  %s484_s2 = scalar_lea.vmem %s410_s14, 16 }
  0x21   :  { %v60_v49 = vadd.f32 %v59_v40, %v58_v45  ;;  %v75_v50 = vadd.f32 %v74_v41, %v73_v46  ;;  %p485_p8 = scmp.ne.s32.totalorder %s410_s14, %s484_s2  ;;  %p490_p10 = scmp.lt.s32.totalorder %s488_s15, %s484_s2 }
  0x22   :  { %265 = vperm.xlu1 %459, %v442_v25   ;;  %261 = vperm.xlu0 %458, %v441_v28  }
  0x23   :  { %v62_v55 = vadd.f32 %v61_v47, %v60_v49  ;;  %v77_v56 = vadd.f32 %v76_v48, %v75_v50  ;;  %p491_p11 = por %p490_p10, %p489_p9 }
  0x25   :  { %v64_v57 = vadd.f32 %v63_v51, %v62_v55  ;;  %v79_v58 = vadd.f32 %v78_v52, %v77_v56  ;;  %p492_p12 = pnand %p491_p11, %p485_p8 }
  0x26   :  { %329 = vperm.xlu1 %459, %v444_v39   ;;  %325 = vperm.xlu0 %458, %v443_v42  }
  0x27   :  { %v80_v61 = vsel %vm49_vm0, %v64_v57, 0.0  ;;  %v81_v62 = vsel %vm49_vm0, %v79_v58, 0.0 }
  0x28   :  { %v82_v63 = vadd.f32 %v81_v62, %v80_v61 }
  0x2a   :  { %337 = vperm.xlu1 %459, %v446_v53   ;;  %333 = vperm.xlu0 %458, %v445_v54   ;;  %v83_v0 = vrot.slane %v82_v63, 4 }
  0x2c   :  { %v84_v3 = vadd.f32 %v83_v0, %v82_v63 }
  0x2e   :  { %345 = vperm.xlu1 %459, %v448_v59   ;;  %341 = vperm.xlu0 %458, %v447_v60   ;;  %v85_v4 = vrot.slane %v84_v3, 2 }
  0x30   :  { %v86_v5 = vadd.f32 %v85_v4, %v84_v3 }
  0x32   :  { %353 = vperm.xlu1 %459, %v450_v1   ;;  %349 = vperm.xlu0 %458, %v449_v2   ;;  %v87_v6 = vrot.slane %v86_v5, 1 }
  0x34   :  { %v88_v12 = vadd.f32 %v87_v6, %v86_v5 }
  0x36   :  { %v90_v13 = vmul.f32 0.0078125, %v88_v12 }
  0x38   :  { %v723_v17 = vsub.f32 %v626_v7, %v90_v13  ;;  %v726_v18 = vsub.f32 %v630_v9, %v90_v13  ;;  %389 = vst.msk [vmem:[#allocation6] sm:$0x1] %vm388_vm1, %v90_v13  ;;  %v730_v19 = vsub.f32 %v634_v11, %v90_v13 }
  0x39   :  { %495 = shalt.err (!%p492_p12)
}
  0x3a   :  { %s496_s18 = scalar_lea.hbm %s897_s4, 16 }
  0x3b   :  { %p497_p13 = scmp.ne.s32.totalorder %s897_s4, %s496_s18  ;;  %p500_p0 = scmp.lt.u32.totalorder %s496_s18, %s897_s4 }
  0x3d   :  { %p502_p1 = pnand %p500_p0, %p497_p13 }
  0x3f   :  { %505 = shalt.err (!%p502_p1)
}
  0x40   :  { %412 = dma.vmem_to_hbm [thread:$0]  %s410_s14, 16, %s897_s4, [#allocation7]   ;;  %v745_v7 = vsub.f32 %v628_v8, %v90_v13  ;;  %v748_v9 = vsub.f32 %v632_v10, %v90_v13  ;;  %v751_v11 = vsub.f32 %v640_v14, %v90_v13  ;;  %v754_v22 = vsub.f32 %v642_v15, %v90_v13 }
  0x41   :  { %v757_v23 = vsub.f32 %v644_v16, %v90_v13  ;;  %v760_v24 = vsub.f32 %v652_v20, %v90_v13  ;;  %v107_v25 = vmul.f32 %v723_v17, %v723_v17  ;;  %v109_v8 = vmul.f32 %v726_v18, %v726_v18  ;;  %s561_s4 = smov [#allocation8]  }
  0x42   :  { %v767_v10 = vsub.f32 %v654_v21, %v90_v13  ;;  %v770_v14 = vsub.f32 %v668_v29, %v90_v13  ;;  %v111_v15 = vmul.f32 %v730_v19, %v730_v19  ;;  %v108_v16 = vmul.f32 %v745_v7, %v745_v7  ;;  %s419_s24 = sshll.u32 %s561_s4, 4  ;;  %s420_s24 = int_to_ptr.vmem [resolvable:$true] %s419_s24 }
  0x43   :  { %v110_v20 = vmul.f32 %v748_v9, %v748_v9  ;;  %v112_v26 = vmul.f32 %v751_v11, %v751_v11  ;;  %v113_v27 = vmul.f32 %v754_v22, %v754_v22  ;;  %v783_v21 = vsub.f32 %v670_v30, %v90_v13  ;;  %s506_s25 = scalar_lea.vmem %s420_s24, 16  ;;  %s510_s26 = scalar_lea.vmem %s420_s24, 32 }
  0x44   :  { %v786_v28 = vsub.f32 %v676_v35, %v90_v13  ;;  %v789_v29 = vsub.f32 %v678_v36, %v90_v13  ;;  %v114_v31 = vmul.f32 %v757_v23, %v757_v23  ;;  %v115_v32 = vmul.f32 %v760_v24, %v760_v24  ;;  %p507_p2 = scmp.ne.s32.totalorder %s420_s24, %s506_s25  ;;  %p511_p3 = scmp.lt.s32.totalorder %s420_s24, %s420_s24 }
  0x45   :  { %v123_v33 = vsel %vm49_vm0, %v107_v25, 0.0  ;;  %v124_v34 = vsel %vm49_vm0, %v109_v8, 0.0  ;;  %v126_v37 = vsel %vm49_vm0, %v111_v15, 0.0  ;;  %v799_v30 = vsub.f32 %v690_v43, %v90_v13  ;;  %p512_p4 = scmp.lt.s32.totalorder %s510_s26, %s506_s25 }
  0x46   :  { %v116_v35 = vmul.f32 %v767_v10, %v767_v10  ;;  %v117_v36 = vmul.f32 %v770_v14, %v770_v14  ;;  %v125_v38 = vadd.f32 %v124_v34, %v123_v33  ;;  %v128_v39 = vsel %vm49_vm0, %v113_v27, 0.0 }
  0x47   :  { %v138_v40 = vsel %vm49_vm0, %v108_v16, 0.0  ;;  %v139_v41 = vsel %vm49_vm0, %v110_v20, 0.0  ;;  %v141_v42 = vsel %vm49_vm0, %v112_v26, 0.0  ;;  %v810_v45 = vsub.f32 %v692_v44, %v90_v13  ;;  %p513_p5 = por %p512_p4, %p511_p3 }
  0x48   :  { %v127_v43 = vadd.f32 %v126_v37, %v125_v38  ;;  %v140_v46 = vadd.f32 %v139_v41, %v138_v40  ;;  %v118_v47 = vmul.f32 %v783_v21, %v783_v21  ;;  %v119_v48 = vmul.f32 %v786_v28, %v786_v28 }
  0x49   :  { %v130_v49 = vsel %vm49_vm0, %v115_v32, 0.0  ;;  %v143_v50 = vsel %vm49_vm0, %v114_v31, 0.0  ;;  %v120_v53 = vmul.f32 %v789_v29, %v789_v29  ;;  %v121_v44 = vmul.f32 %v799_v30, %v799_v30  ;;  %p514_p6 = pnand %p513_p5, %p507_p2 }
  0x4a   :  { %v129_v51 = vadd.f32 %v128_v39, %v127_v43  ;;  %v142_v52 = vadd.f32 %v141_v42, %v140_v46  ;;  %v132_v54 = vsel %vm49_vm0, %v117_v36, 0.0  ;;  %v145_v55 = vsel %vm49_vm0, %v116_v35, 0.0 }
  0x4b   :  { %v122_v58 = vmul.f32 %v810_v45, %v810_v45  ;;  %v134_v59 = vsel %vm49_vm0, %v119_v48, 0.0  ;;  %v147_v60 = vsel %vm49_vm0, %v118_v47, 0.0  ;;  %v136_v63 = vsel %vm49_vm0, %v121_v44, 0.0 }
  0x4c   :  { %v131_v56 = vadd.f32 %v130_v49, %v129_v51  ;;  %v144_v57 = vadd.f32 %v143_v50, %v142_v52  ;;  %v149_v0 = vsel %vm49_vm0, %v120_v53, 0.0 }
  0x4d   :  { %v151_v3 = vsel %vm49_vm0, %v122_v58, 0.0 }
  0x4e   :  { %v133_v61 = vadd.f32 %v132_v54, %v131_v56  ;;  %v146_v62 = vadd.f32 %v145_v55, %v144_v57 }
  0x50   :  { %v135_v1 = vadd.f32 %v134_v59, %v133_v61  ;;  %v148_v2 = vadd.f32 %v147_v60, %v146_v62 }
  0x52   :  { %v137_v4 = vadd.f32 %v136_v63, %v135_v1  ;;  %v150_v5 = vadd.f32 %v149_v0, %v148_v2 }
  0x54   :  { %v152_v6 = vadd.f32 %v151_v3, %v150_v5  ;;  %v153_v12 = vsel %vm49_vm0, %v137_v4, 0.0 }
  0x56   :  { %v154_v13 = vsel %vm49_vm0, %v152_v6, 0.0 }
  0x57   :  { %v155_v25 = vadd.f32 %v154_v13, %v153_v12 }
  0x59   :  { %v156_v8 = vrot.slane %v155_v25, 4 }
  0x5b   :  { %v157_v15 = vadd.f32 %v156_v8, %v155_v25 }
  0x5d   :  { %v158_v16 = vrot.slane %v157_v15, 2 }
  0x5f   :  { %v159_v20 = vadd.f32 %v158_v16, %v157_v15 }
  0x61   :  { %v160_v26 = vrot.slane %v159_v20, 1 }
  0x63   :  { %v161_v27 = vadd.f32 %v160_v26, %v159_v20 }
  0x65   :  { %v162_v31 = vmul.f32 0.0078125, %v161_v27 }
  0x67   :  { %390 = vst.msk [vmem:[#allocation8] sm:$0x1] %vm388_vm1, %v162_v31 }
  0x68   :  { %517 = shalt.err (!%p514_p6)
}
  0x69   :  { %s518_s6 = scalar_lea.hbm %s898_s5, 16 }
  0x6a   :  { %p519_p7 = scmp.ne.s32.totalorder %s898_s5, %s518_s6  ;;  %p522_p8 = scmp.lt.u32.totalorder %s518_s6, %s898_s5 }
  0x6c   :  { %p524_p9 = pnand %p522_p8, %p519_p7 }
  0x6e   :  { %527 = shalt.err (!%p524_p9)
}
  0x6f   :  { %422 = dma.vmem_to_hbm [thread:$0]  %s420_s24, 16, %s898_s5, [#allocation7]   ;;  %460 = vrsqrt.f32 %v162_v31 }
  0x70   :  { %s562_s5 = smov [#allocation5]  }
  0x71   :  { %s396_s0 = sshll.u32 %s562_s5, 4  ;;  %s397_s0 = int_to_ptr.vmem [resolvable:$true] %s396_s0 }
  0x72   :  { %s528_s13 = scalar_lea.vmem %s397_s0, 2048  ;;  %p533_p11 = scmp.lt.s32.totalorder %s397_s0, %s397_s0 }
  0x73   :  { %p529_p10 = scmp.ne.s32.totalorder %s397_s0, %s528_s13  ;;  %p534_p12 = scmp.lt.s32.totalorder %s528_s13, %s528_s13 }
  0x75   :  { %p535_p13 = por %p534_p12, %p533_p11 }
  0x77   :  { %p536_p0 = pnand %p535_p13, %p529_p10 }
  0x79   :  { %v461_v35 = vpop.eup %460 }
  0x7a   :  { %v180_v39 = vmul.f32 %v461_v35, %v723_v17  ;;  %v181_v40 = vmul.f32 %v461_v35, %v745_v7  ;;  %v182_v41 = vmul.f32 %v461_v35, %v726_v18  ;;  %v183_v42 = vmul.f32 %v461_v35, %v748_v9 }
  0x7b   :  { %v184_v47 = vmul.f32 %v461_v35, %v730_v19  ;;  %v185_v48 = vmul.f32 %v461_v35, %v751_v11  ;;  %v186_v49 = vmul.f32 %v461_v35, %v754_v22  ;;  %v187_v50 = vmul.f32 %v461_v35, %v757_v23 }
  0x7c   :  { %v190_v56 = vmul.f32 %v461_v35, %v770_v14  ;;  %v191_v19 = vmul.f32 %v461_v35, %v783_v21  ;;  %v188_v11 = vmul.f32 %v461_v35, %v760_v24  ;;  %v189_v22 = vmul.f32 %v461_v35, %v767_v10 }
  0x7d   :  { %v194_v10 = vmul.f32 %v461_v35, %v799_v30  ;;  %v195_v63 = vmul.f32 %v461_v35, %v810_v45  ;;  %v192_v0 = vmul.f32 %v461_v35, %v786_v28  ;;  %v193_v1 = vmul.f32 %v461_v35, %v789_v29 }
  0x95   :  { %v246_v32 = vpop.permute.xlu1 %245  ;;  %v238_v33 = vpop.permute.xlu0 %237 }
  0x96   :  { %v268_v51 = vmul.f32 %v238_v33, %v180_v39  ;;  %v269_v52 = vmul.f32 %v238_v33, %v181_v40  ;;  %v272_v57 = vmul.f32 %v246_v32, %v184_v47  ;;  %v273_v23 = vmul.f32 %v246_v32, %v185_v48 }
  0x99   :  { %v250_v34 = vpop.permute.xlu1 %249  ;;  %v242_v37 = vpop.permute.xlu0 %241 }
  0x9a   :  { %v270_v53 = vmul.f32 %v242_v37, %v182_v41  ;;  %v271_v17 = vmul.f32 %v242_v37, %v183_v42  ;;  %v274_v58 = vmul.f32 %v250_v34, %v186_v49  ;;  %v275_v59 = vmul.f32 %v250_v34, %v187_v50 }
  0x9d   :  { %v258_v36 = vpop.permute.xlu1 %257  ;;  %v254_v38 = vpop.permute.xlu0 %253 }
  0x9e   :  { %v278_v2 = vmul.f32 %v258_v36, %v190_v56  ;;  %v279_v3 = vmul.f32 %v258_v36, %v191_v19  ;;  %v276_v4 = vmul.f32 %v254_v38, %v188_v11  ;;  %v277_v5 = vmul.f32 %v254_v38, %v189_v22 }
  0xa1   :  { %v266_v43 = vpop.permute.xlu1 %265  ;;  %v262_v46 = vpop.permute.xlu0 %261 }
  0xa2   :  { %v282_v29 = vmul.f32 %v266_v43, %v194_v10  ;;  %v283_v25 = vmul.f32 %v266_v43, %v195_v63  ;;  %v280_v8 = vmul.f32 %v262_v46, %v192_v0  ;;  %v281_v15 = vmul.f32 %v262_v46, %v193_v1 }
  0xa5   :  { %v330_v44 = vpop.permute.xlu1 %329  ;;  %v326_v7 = vpop.permute.xlu0 %325 }
  0xa6   :  { %v358_v54 = vadd.f32 %v330_v44, %v270_v53  ;;  %v359_v18 = vadd.f32 %v330_v44, %v271_v17  ;;  %v356_v55 = vadd.f32 %v326_v7, %v268_v51  ;;  %v357_v9 = vadd.f32 %v326_v7, %v269_v52 }
  0xa8   :  { %374 = vst.msk [vmem:[#allocation5 + $0x10] sm:$0xff] %vm49_vm0, %v358_v54  ;;  %375 = vst.msk [vmem:[#allocation5 + $0x18] sm:$0xff] %vm49_vm0, %v359_v18 }
  0xa9   :  { %372 = vst.msk [vmem:[#allocation5] sm:$0xff] %vm49_vm0, %v356_v55  ;;  %373 = vst.msk [vmem:[#allocation5 + $0x8] sm:$0xff] %vm49_vm0, %v357_v9  ;;  %v338_v60 = vpop.permute.xlu1 %337  ;;  %v334_v14 = vpop.permute.xlu0 %333 }
  0xaa   :  { %v362_v61 = vadd.f32 %v338_v60, %v274_v58  ;;  %v363_v21 = vadd.f32 %v338_v60, %v275_v59  ;;  %v360_v62 = vadd.f32 %v334_v14, %v272_v57  ;;  %v361_v24 = vadd.f32 %v334_v14, %v273_v23 }
  0xac   :  { %378 = vst.msk [vmem:[#allocation5 + $0x30] sm:$0xff] %vm49_vm0, %v362_v61  ;;  %379 = vst.msk [vmem:[#allocation5 + $0x38] sm:$0xff] %vm49_vm0, %v363_v21 }
  0xad   :  { %376 = vst.msk [vmem:[#allocation5 + $0x20] sm:$0xff] %vm49_vm0, %v360_v62  ;;  %377 = vst.msk [vmem:[#allocation5 + $0x28] sm:$0xff] %vm49_vm0, %v361_v24  ;;  %v346_v6 = vpop.permute.xlu1 %345  ;;  %v342_v30 = vpop.permute.xlu0 %341 }
  0xae   :  { %v366_v12 = vadd.f32 %v346_v6, %v278_v2  ;;  %v367_v45 = vadd.f32 %v346_v6, %v279_v3  ;;  %v364_v13 = vadd.f32 %v342_v30, %v276_v4  ;;  %v365_v28 = vadd.f32 %v342_v30, %v277_v5 }
  0xb0   :  { %382 = vst.msk [vmem:[#allocation5 + $0x50] sm:$0xff] %vm49_vm0, %v366_v12  ;;  %383 = vst.msk [vmem:[#allocation5 + $0x58] sm:$0xff] %vm49_vm0, %v367_v45 }
  0xb1   :  { %380 = vst.msk [vmem:[#allocation5 + $0x40] sm:$0xff] %vm49_vm0, %v364_v13  ;;  %381 = vst.msk [vmem:[#allocation5 + $0x48] sm:$0xff] %vm49_vm0, %v365_v28  ;;  %v354_v16 = vpop.permute.xlu1 %353  ;;  %v350_v20 = vpop.permute.xlu0 %349 }
  0xb2   :  { %v370_v26 = vadd.f32 %v354_v16, %v282_v29  ;;  %v371_v27 = vadd.f32 %v354_v16, %v283_v25  ;;  %v368_v31 = vadd.f32 %v350_v20, %v280_v8  ;;  %v369_v32 = vadd.f32 %v350_v20, %v281_v15 }
  0xb4   :  { %386 = vst.msk [vmem:[#allocation5 + $0x70] sm:$0xff] %vm49_vm0, %v370_v26  ;;  %387 = vst.msk [vmem:[#allocation5 + $0x78] sm:$0xff] %vm49_vm0, %v371_v27 }
  0xb5   :  { %384 = vst.msk [vmem:[#allocation5 + $0x60] sm:$0xff] %vm49_vm0, %v368_v31  ;;  %385 = vst.msk [vmem:[#allocation5 + $0x68] sm:$0xff] %vm49_vm0, %v369_v32 }
  0xb6   :  { %539 = shalt.err (!%p536_p0)
}
  0xb7   :  { %s540_s15 = scalar_lea.hbm %s896_s3, 2048 }
  0xb8   :  { %p541_p1 = scmp.ne.s32.totalorder %s896_s3, %s540_s15  ;;  %p544_p2 = scmp.lt.u32.totalorder %s540_s15, %s896_s3 }
  0xba   :  { %p546_p3 = pnand %p544_p2, %p541_p1 }
  0xbc   :  { %549 = shalt.err (!%p546_p3)
}
  0xbd   :  { %402 = dma.vmem_to_hbm [thread:$0]  %s397_s0, 2048, %s896_s3, [#allocation4], %s557_s28, %s557_s28, %s558_s29  }
  0xbe   :  { %552 = dma.done.wait [#allocation4], 2048  }
  0xbf   :  { %553 = vsyncadd [#allocation4], 4294965248 }
  0xc0   :  { %554 = dma.done.wait [#allocation7], 32  }
  0xc1   :  { %555 = vsyncadd [#allocation7], 4294967264 }
  0xc2   :  { %432 = vsyncpa [#allocation3], 1 }
  0xc3   :  { %433 = vsyncpa [#allocation4], 1 }
  0xc4   :  { %434 = vsyncpa [#allocation7], 1 }

</bundles_post_ra>
